<compile_context>
chip_gen: v7x
topology: tpu7x:2x2x1
jax: 0.10.0
libtpu: 0.0.40
codegen_flags: <defaults>
</compile_context>

<pallas_src>
import functools

import jax
import jax.numpy as jnp
from jax import lax
from jax.experimental import pallas as pl
from jax.experimental.pallas import tpu as pltpu


def _rmsnorm_kernel(x_ref, gamma_ref, o_ref, *, eps, inv_features):
    # NOTE: the tail grid block may read unspecified padded rows.  That is safe
    # because every op here is strictly per-row and out-of-bounds writes are
    # masked -- do NOT add any cross-row statistic to this body.
    x = x_ref[...]                                    # (ROW_TILE, F_pad), I/O dtype
    xf = x.astype(jnp.float32)
    # f32 sum-of-squares; multiply by 1/true_F so lane zero-padding (if any)
    # does not perturb the mean.
    ss = jnp.sum(xf * xf, axis=-1, keepdims=True)     # XLU reduce
    inv = lax.rsqrt(ss * inv_features + eps)          # EUP rsqrt: frees VALU slot
    # f32 epilogue: kernel is HBM-bound, the extra f32 VALU work sits in slack
    # slots; gamma stays resident in f32 (no double rounding for bf16 inputs).
    y = (xf * inv) * gamma_ref[...]
    o_ref[...] = y.astype(o_ref.dtype)


def _num_tensorcores():
    """Best-effort TensorCore-per-chip count (v7x: 2; v5e/v6e: 1)."""
    candidates = ("num_cores", "num_tensorcores", "tensorcore_count", "cores_per_chip")
    try:
        info = pltpu.get_tpu_info()
        for name in candidates:
            v = getattr(info, name, None)
            if v:
                return max(1, int(v))
    except Exception:
        pass
    try:
        d = jax.devices()[0]
        for name in candidates + ("core_count",):
            v = getattr(d, name, None)
            if isinstance(v, int) and v > 0:
                return v
    except Exception:
        pass
    return 1


def _round_up(n, m):
    return -(-n // m) * m


def _pick_row_tile(rows, f_padded, itemsize, num_cores):
    """Largest packing-aligned row tile fitting the VMEM pipeline budget."""
    # Native sublane packing for the I/O dtype: f32 -> 8, bf16 -> 16, int8 -> 32.
    sublane = max(8, 32 // max(1, itemsize))

    try:
        vmem_cap = int(pltpu.get_tpu_info().vmem_capacity_bytes)
    except Exception:
        vmem_cap = 64 << 20  # conservative fallback (v7x per-core VMEM)
    # Leave headroom below physical VMEM; also lifts v5e's 16 MiB default scope.
    vmem_limit = min(int(vmem_cap * 0.8), 96 << 20)

    if rows <= sublane:
        # Single block equal to the full (tiny) array satisfies the (8,128) rule.
        return rows, vmem_limit

    # Per-row VMEM while the pipeline runs: double-buffered input + double-
    # buffered output tiles (I/O dtype) + ~2 f32 in-body temporaries (xf, y).
    per_row_bytes = f_padded * (4 * itemsize + 2 * 4)
    gamma_bytes = f_padded * 4                       # resident f32 gamma
    budget = max(vmem_limit - gamma_bytes, per_row_bytes * sublane)
    # ~15% headroom for compiler internals; no extra halving (per_row_bytes
    # already counts both pipeline copies of input and output).
    budget_tile = int(budget * 0.85) // per_row_bytes
    budget_tile = max(sublane, (budget_tile // sublane) * sublane)

    full_tile = _round_up(rows, sublane)             # one block covering all rows

    if num_cores <= 1:
        # Single TC (v5e/v6e): one maximal block if it fits; no forced split.
        return min(budget_tile, full_tile), vmem_limit

    # Multi-TC (v7x megacore): pick the smallest k such that splitting the rows
    # into num_cores*k balanced, packing-aligned tiles fits the VMEM budget.
    # This keeps the grid a multiple of the core count, so no TC idles.
    k = 1
    while True:
        cand = _round_up(-(-rows // (num_cores * k)), sublane)
        if cand <= budget_tile or cand <= sublane:
            return max(sublane, min(cand, full_tile)), vmem_limit
        k += 1


def rmsnorm(x, gamma, eps=1e-6, row_tile=None):
    orig_shape = x.shape
    features = orig_shape[-1]
    x2d = x.reshape(-1, features)
    rows = x2d.shape[0]
    if rows == 0:
        # Empty leading dims: nothing to normalize.
        return jnp.zeros(orig_shape, dtype=x.dtype)

    # Keep the lane axis dense: pad features to a multiple of 128 if needed.
    f_padded = _round_up(features, 128)
    gamma_f32 = gamma.reshape(1, features).astype(jnp.float32)
    if f_padded != features:
        x2d = jnp.pad(x2d, ((0, 0), (0, f_padded - features)))
        gamma_f32 = jnp.pad(gamma_f32, ((0, 0), (0, f_padded - features)))

    itemsize = jnp.dtype(x.dtype).itemsize
    auto_tile, vmem_limit = _pick_row_tile(rows, f_padded, itemsize, _num_tensorcores())
    if row_tile is None:
        row_tile = auto_tile

    grid = (pl.cdiv(rows, row_tile),)  # no row padding: tail-block writes are masked
    out = pl.pallas_call(
        functools.partial(_rmsnorm_kernel, eps=eps, inv_features=1.0 / features),
        out_shape=jax.ShapeDtypeStruct((rows, f_padded), x.dtype),
        grid_spec=pltpu.PrefetchScalarGridSpec(
            num_scalar_prefetch=0,
            grid=grid,
            in_specs=[
                pl.BlockSpec((row_tile, f_padded), lambda i: (i, 0)),
                # Constant index_map -> gamma stays resident in VMEM (no re-DMA).
                pl.BlockSpec((1, f_padded), lambda i: (0, 0)),
            ],
            out_specs=pl.BlockSpec((row_tile, f_padded), lambda i: (i, 0)),
        ),
        compiler_params=pltpu.CompilerParams(
            dimension_semantics=("parallel",),
            vmem_limit_bytes=vmem_limit,
        ),
    )(x2d, gamma_f32)

    if f_padded != features:
        out = out[:, :features]
    return out.reshape(orig_shape)


if __name__ == "__main__":
    features = 768
    key = jax.random.PRNGKey(0)
    # Small shapes consistent with the module (leading dims flattened to rows).
    x = jax.random.normal(key, (4, 8, features), dtype=jnp.float32)

    # Deterministic parameter init matching nn.Parameter(torch.ones(features)).
    gamma = jnp.ones((features,), dtype=jnp.float32)

    out = rmsnorm(x, gamma, eps=1e-6)
    out = jax.block_until_ready(out)

    # Reference check in plain JAX (matches the PyTorch forward).
    rms = jnp.sqrt(jnp.mean(x * x, axis=-1, keepdims=True) + 1e-6)
    ref = gamma * x / rms
    assert out.shape == x.shape
    assert jnp.allclose(out, ref, atol=1e-5, rtol=1e-5)

    # bf16 path: f32 epilogue keeps error at bf16 rounding level.
    xb = x.astype(jnp.bfloat16)
    outb = jax.block_until_ready(rmsnorm(xb, gamma, eps=1e-6))
    refb = (gamma * xb.astype(jnp.float32)
            / jnp.sqrt(jnp.mean(xb.astype(jnp.float32) ** 2, axis=-1, keepdims=True) + 1e-6))
    assert outb.dtype == jnp.bfloat16
    assert jnp.allclose(outb.astype(jnp.float32), refb, atol=2e-2, rtol=2e-2)

    print("KERNEL_OK")
</pallas_src>

<mosaic_0001>
module attributes {stable_mosaic.version = 11 : i64} {
  func.func @_rmsnorm_kernel(%arg0: i32, %arg1: memref<32x768xf32, #tpu.memory_space<vmem>>, %arg2: memref<1x768xf32, #tpu.memory_space<vmem>>, %arg3: memref<32x768xf32, #tpu.memory_space<vmem>>) attributes {dimension_semantics = [#tpu.dimension_semantics<parallel>], iteration_bounds = array<i64: 1>, scalar_prefetch = 0 : i64, scratch_operands = 0 : i64, tpu.core_type = #tpu.core_type<tc>, window_params = [{transform_indices = @transform_0, window_bounds = array<i64: 32, 768>}, {pipeline_mode = #tpu.pipeline_mode<synchronous>, transform_indices = @transform_1, window_bounds = array<i64: 1, 768>}, {transform_indices = @transform_2, window_bounds = array<i64: 32, 768>}]} {
    %c0 = arith.constant 0 : index
    %c0_0 = arith.constant 0 : index
    %0 = vector.load %arg1[%c0, %c0_0] : memref<32x768xf32, #tpu.memory_space<vmem>>, vector<32x768xf32>
    %1 = arith.mulf %0, %0 : vector<32x768xf32>
    %cst = arith.constant dense<0.000000e+00> : vector<32xf32>
    %2 = vector.multi_reduction <add>, %1, %cst [1] : vector<32x768xf32> to vector<32xf32>
    %3 = vector.shape_cast %2 : vector<32xf32> to vector<32x1xf32>
    %cst_1 = arith.constant 0.00130208337 : f32
    %4 = vector.broadcast %cst_1 : f32 to vector<32x1xf32>
    %5 = arith.mulf %3, %4 : vector<32x1xf32>
    %cst_2 = arith.constant 9.99999997E-7 : f32
    %6 = vector.broadcast %cst_2 : f32 to vector<32x1xf32>
    %7 = arith.addf %5, %6 : vector<32x1xf32>
    %8 = math.rsqrt %7 : vector<32x1xf32>
    %9 = vector.broadcast %8 : vector<32x1xf32> to vector<32x768xf32>
    %10 = arith.mulf %0, %9 : vector<32x768xf32>
    %c0_3 = arith.constant 0 : index
    %c0_4 = arith.constant 0 : index
    %11 = vector.load %arg2[%c0_3, %c0_4] : memref<1x768xf32, #tpu.memory_space<vmem>>, vector<1x768xf32>
    %12 = vector.broadcast %11 : vector<1x768xf32> to vector<32x768xf32>
    %13 = arith.mulf %10, %12 : vector<32x768xf32>
    %c0_5 = arith.constant 0 : index
    %c0_6 = arith.constant 0 : index
    %14 = vector.load %arg3[%c0_5, %c0_6] : memref<32x768xf32, #tpu.memory_space<vmem>>, vector<32x768xf32>
    tpu.vector_store %arg3[%c0_5, %c0_6], %13 {strides = array<i32>} : memref<32x768xf32, #tpu.memory_space<vmem>>, vector<32x768xf32>,
    return
  }
  func.func @transform_0(%arg0: i32) -> (i32, i32) {
    %c0_i32 = arith.constant 0 : i32
    %c0_i32_0 = arith.constant 0 : i32
    return %arg0, %c0_i32 : i32, i32
  }
  func.func @transform_1(%arg0: i32) -> (i32, i32) {
    %c0_i32 = arith.constant 0 : i32
    %c0_i32_0 = arith.constant 0 : i32
    %c0_i32_1 = arith.constant 0 : i32
    return %c0_i32, %c0_i32_0 : i32, i32
  }
  func.func @transform_2(%arg0: i32) -> (i32, i32) {
    %c0_i32 = arith.constant 0 : i32
    %c0_i32_0 = arith.constant 0 : i32
    return %arg0, %c0_i32 : i32, i32
  }
}

</mosaic_0001>

<bundles_post_ra>
// kernel: tpu_custom_call.1
= control target key start
LH: loop header
LB: loop body
LE: loop exit
PB: predicated region body
PF: predicated region fallthrough
CT: control target
= control target key end

     0   :  { %7 = vsyncpa [#allocation3], 0  ;;  %s551_s0 = inlined_call_operand.hbm [shape: f32[32,768], index: 0, kind: input, shape index: {}]   ;;  %s552_s1 = inlined_call_operand.hbm [shape: f32[1,768], index: 1, kind: input, shape index: {}]   ;;  %s553_s2 = inlined_call_operand.hbm [shape: f32[32,768], index: 2, kind: output, shape index: {}]  }
   0x1   :  { %8 = vsyncpa [#allocation6], 0 }
   0x2   :  { %9 = vsyncpa [#allocation4], 0  ;;  %s333_s9 = smov [#allocation2]   ;;  %s261_s13 = scalar_lea.hbm %s551_s0, 3072 }
   0x3   :  { %s15_s10 = sshll.u32 %s333_s9, 4  ;;  %p262_p0 = scmp.ne.s32.totalorder %s551_s0, %s261_s13  ;;  %s16_s10 = int_to_ptr.vmem [resolvable:$true] %s15_s10 }
   0x4   :  { %p265_p1 = scmp.lt.u32.totalorder %s261_s13, %s551_s0 }
   0x6   :  { %p267_p2 = pnand %p265_p1, %p262_p0 }
   0x8   :  { %270 = shalt.err (!%p267_p2)
}
   0x9   :  { %s271_s18 = scalar_lea.vmem %s16_s10, 3072  ;;  %p276_p4 = scmp.lt.s32.totalorder %s16_s10, %s16_s10 }
   0xa   :  { %p272_p3 = scmp.ne.s32.totalorder %s16_s10, %s271_s18  ;;  %p277_p5 = scmp.lt.s32.totalorder %s271_s18, %s271_s18 }
   0xc   :  { %p278_p6 = por %p277_p5, %p276_p4 }
   0xe   :  { %p279_p7 = pnand %p278_p6, %p272_p3 }
  0x10   :  { %282 = shalt.err (!%p279_p7)
}
  0x11   :  { %s334_s19 = smov 768   ;;  %s335_s20 = smov 48  }
  0x12   :  { %21 = dma.hbm_to_vmem [thread:$0]  %s551_s0, 3072, %s16_s10, [#allocation3], %s334_s19, %s334_s19, %s335_s20  }
  0x13   :  { %s336_s23 = smov [#allocation5]   ;;  %s283_s27 = scalar_lea.hbm %s552_s1, 96 }
  0x14   :  { %s28_s24 = sshll.u32 %s336_s23, 4  ;;  %p284_p8 = scmp.ne.s32.totalorder %s552_s1, %s283_s27  ;;  %s29_s24 = int_to_ptr.vmem [resolvable:$true] %s28_s24 }
  0x15   :  { %p287_p9 = scmp.lt.u32.totalorder %s283_s27, %s552_s1 }
  0x17   :  { %p289_p10 = pnand %p287_p9, %p284_p8 }
  0x19   :  { %292 = shalt.err (!%p289_p10)
}
  0x1a   :  { %s293_s4 = scalar_lea.vmem %s29_s24, 96  ;;  %p298_p12 = scmp.lt.s32.totalorder %s29_s24, %s29_s24 }
  0x1b   :  { %p294_p11 = scmp.ne.s32.totalorder %s29_s24, %s293_s4  ;;  %p299_p13 = scmp.lt.s32.totalorder %s293_s4, %s293_s4 }
  0x1d   :  { %p300_p0 = por %p299_p13, %p298_p12 }
  0x1f   :  { %p301_p1 = pnand %p300_p0, %p294_p11 }
  0x21   :  { %304 = shalt.err (!%p301_p1)
}
  0x22   :  { %31 = dma.hbm_to_vmem [thread:$0]  %s552_s1, 96, %s29_s24, [#allocation6]  }
  0x23   :  { %327 = dma.done.wait [#allocation3], 3072  }
  0x24   :  { %328 = vsyncadd [#allocation3], 4294964224 }
  0x25   :  { %329 = dma.done.wait [#allocation6], 96  }
  0x26   :  { %330 = vsyncadd [#allocation6], 4294967200  ;;  %v380_v0 = vld [vmem:[#allocation2 + $0x60] sm:$0xff]  ;;  %v382_v1 = vld [vmem:[#allocation2 + $0x68] sm:$0xff]  ;;  %s337_s1 = smov [#allocation7]  }
  0x27   :  { %v384_v2 = vld [vmem:[#allocation2 + $0x70] sm:$0xff]  ;;  %v386_v3 = vld [vmem:[#allocation2 + $0x78] sm:$0xff]  ;;  %v388_v4 = vld [vmem:[#allocation2 + $0x80] sm:$0xff]  ;;  %v74_v5 = vmul.f32 %v380_v0, %v380_v0  ;;  %v75_v6 = vmul.f32 %v382_v1, %v382_v1  ;;  %s235_s6 = sshll.u32 %s337_s1, 4  ;;  %s236_s6 = int_to_ptr.vmem [resolvable:$true] %s235_s6 }
  0x28   :  { %v76_v7 = vmul.f32 %v384_v2, %v384_v2  ;;  %v77_v8 = vmul.f32 %v386_v3, %v386_v3  ;;  %v398_v9 = vld [vmem:[#allocation2] sm:$0xff]  ;;  %v400_v10 = vld [vmem:[#allocation2 + $0x8] sm:$0xff]  ;;  %v402_v11 = vld [vmem:[#allocation2 + $0x10] sm:$0xff]  ;;  %v78_v19 = vmul.f32 %v388_v4, %v388_v4  ;;  %s305_s7 = scalar_lea.vmem %s236_s6, 3072  ;;  %p310_p3 = scmp.lt.s32.totalorder %s236_s6, %s236_s6 }
  0x29   :  { %v404_v12 = vld [vmem:[#allocation2 + $0x88] sm:$0xff]  ;;  %v100_v13 = vadd.f32 %v75_v6, %v74_v5  ;;  %v406_v14 = vld [vmem:[#allocation2 + $0x18] sm:$0xff]  ;;  %v408_v15 = vld [vmem:[#allocation2 + $0x20] sm:$0xff]  ;;  %v62_v16 = vmul.f32 %v398_v9, %v398_v9  ;;  %v63_v17 = vmul.f32 %v400_v10, %v400_v10  ;;  %v64_v18 = vmul.f32 %v402_v11, %v402_v11  ;;  %p306_p2 = scmp.ne.s32.totalorder %s236_s6, %s305_s7  ;;  %p311_p4 = scmp.lt.s32.totalorder %s305_s7, %s305_s7 }
  0x2a   :  { %v65_v20 = vmul.f32 %v406_v14, %v406_v14  ;;  %v420_v21 = vld [vmem:[#allocation2 + $0x90] sm:$0xff]  ;;  %v422_v22 = vld [vmem:[#allocation2 + $0x98] sm:$0xff]  ;;  %v424_v23 = vld [vmem:[#allocation2 + $0xa0] sm:$0xff]  ;;  %v79_v31 = vmul.f32 %v404_v12, %v404_v12  ;;  %v66_v32 = vmul.f32 %v408_v15, %v408_v15 }
  0x2b   :  { %v101_v24 = vadd.f32 %v100_v13, %v76_v7  ;;  %v426_v25 = vld [vmem:[#allocation2 + $0x28] sm:$0xff]  ;;  %v86_v26 = vadd.f32 %v63_v17, %v62_v16  ;;  %v430_v28 = vld [vmem:[#allocation2 + $0xb0] sm:$0xff]  ;;  %v80_v29 = vmul.f32 %v420_v21, %v420_v21  ;;  %v81_v30 = vmul.f32 %v422_v22, %v422_v22  ;;  %v446_v36 = vld [vmem:[#allocation2 + $0x38] sm:$0xff]  ;;  %p312_p5 = por %p311_p4, %p310_p3 }
  0x2c   :  { %v428_v27 = vld [vmem:[#allocation2 + $0xa8] sm:$0xff]  ;;  %v82_v33 = vmul.f32 %v424_v23, %v424_v23  ;;  %v444_v35 = vld [vmem:[#allocation2 + $0x30] sm:$0xff]  ;;  %v448_v37 = vld [vmem:[#allocation2 + $0x40] sm:$0xff]  ;;  %v67_v43 = vmul.f32 %v426_v25, %v426_v25  ;;  %v69_v45 = vmul.f32 %v446_v36, %v446_v36  ;;  %v84_v49 = vmul.f32 %v430_v28, %v430_v28 }
  0x2d   :  { %v83_v34 = vmul.f32 %v428_v27, %v428_v27  ;;  %v102_v38 = vadd.f32 %v101_v24, %v77_v8  ;;  %v87_v39 = vadd.f32 %v86_v26, %v64_v18  ;;  %v107_v40 = vadd.f32 %v81_v30, %v80_v29  ;;  %v450_v41 = vld [vmem:[#allocation2 + $0x48] sm:$0xff]  ;;  %v456_v44 = vld [vmem:[#allocation2 + $0xb8] sm:$0xff]  ;;  %v464_v51 = vld [vmem:[#allocation2 + $0x50] sm:$0xff]  ;;  %p313_p6 = pnand %p312_p5, %p306_p2 }
  0x2e   :  { %v68_v42 = vmul.f32 %v444_v35, %v444_v35  ;;  %v70_v46 = vmul.f32 %v448_v37, %v448_v37  ;;  %v71_v52 = vmul.f32 %v450_v41, %v450_v41  ;;  %v85_v56 = vmul.f32 %v456_v44, %v456_v44  ;;  %v470_v58 = vld [vmem:[#allocation2 + $0x58] sm:$0xff] }
  0x2f   :  { %v103_v47 = vadd.f32 %v102_v38, %v78_v19  ;;  %v88_v48 = vadd.f32 %v87_v39, %v65_v20  ;;  %v108_v50 = vadd.f32 %v107_v40, %v82_v33  ;;  %v72_v59 = vmul.f32 %v464_v51, %v464_v51 }
  0x30   :  { %v93_v53 = vadd.f32 %v69_v45, %v68_v42  ;;  %v73_v63 = vmul.f32 %v470_v58, %v470_v58  ;;  %v152_v16 = vlaneseq }
  0x31   :  { %v104_v54 = vadd.f32 %v103_v47, %v79_v31  ;;  %v89_v55 = vadd.f32 %v88_v48, %v66_v32  ;;  %v109_v57 = vadd.f32 %v108_v50, %v83_v34 }
  0x32   :  { %v94_v60 = vadd.f32 %v93_v53, %v70_v46  ;;  %v153_v26 = vshrl.u32 %v152_v16, 7 }
  0x33   :  { %105 = vadd.xlane.f32.xlu1 %v104_v54  ;;  %v90_v61 = vadd.f32 %v89_v55, %v67_v43  ;;  %v110_v62 = vadd.f32 %v109_v57, %v84_v49  ;;  %v150_v43 = vld [vmem:[#allocation5] sm:$0x3f] }
  0x34   :  { %v95_v5 = vadd.f32 %v94_v60, %v71_v52  ;;  %v154_v34 = vsub.s32 0, %v153_v26  ;;  %v158_v38 = vsub.s32 1, %v153_v26  ;;  %v162_v39 = vsub.s32 2, %v153_v26 }
  0x35   :  { %91 = vadd.xlane.f32.xlu0 %v90_v61  ;;  %v111_v6 = vadd.f32 %v110_v62, %v85_v56  ;;  %v166_v40 = vsub.s32 3, %v153_v26  ;;  %v170_v45 = vsub.s32 4, %v153_v26  ;;  %v174_v46 = vsub.s32 5, %v153_v26 }
  0x36   :  { %v96_v7 = vadd.f32 %v95_v5, %v72_v59  ;;  %v476_v47 = vrot.slane %v150_v43, %v154_v34  ;;  %v478_v48 = vrot.slane %v150_v43, %v158_v38  ;;  %v480_v49 = vrot.slane %v150_v43, %v162_v39 }
  0x37   :  { %112 = vadd.xlane.f32.xlu1 %v111_v6  ;;  %v482_v50 = vrot.slane %v150_v43, %v166_v40  ;;  %v484_v53 = vrot.slane %v150_v43, %v170_v45  ;;  %v486_v54 = vrot.slane %v150_v43, %v174_v46 }
  0x38   :  { %v97_v8 = vadd.f32 %v96_v7, %v73_v63 }
  0x3a   :  { %98 = vadd.xlane.f32.xlu0 %v97_v8 }
  0xc0   :  { %v106_v13 = vpop.xlane.xlu1 %105 }
  0xc1   :  { %v116_v17 = vmul.f32 0.0013020834, %v106_v13 }
  0xc2   :  { %v92_v18 = vpop.xlane.xlu0 %91 }
  0xc3   :  { %v120_v19 = vadd.f32 1e-06, %v116_v17  ;;  %v114_v20 = vmul.f32 0.0013020834, %v92_v18 }
  0xc4   :  { %v113_v24 = vpop.xlane.xlu1 %112 }
  0xc5   :  { %253 = vrsqrt.f32 %v120_v19  ;;  %v118_v29 = vadd.f32 1e-06, %v114_v20  ;;  %v117_v30 = vmul.f32 0.0013020834, %v113_v24 }
  0xc7   :  { %255 = vrsqrt.f32 %v118_v29  ;;  %v121_v31 = vadd.f32 1e-06, %v117_v30  ;;  %v99_v32 = vpop.xlane.xlu0 %98 }
  0xc8   :  { %v115_v33 = vmul.f32 0.0013020834, %v99_v32 }
  0xc9   :  { %257 = vrsqrt.f32 %v121_v31 }
  0xca   :  { %v119_v42 = vadd.f32 1e-06, %v115_v33 }
  0xcc   :  { %259 = vrsqrt.f32 %v119_v42 }
  0xcf   :  { %v254_v52 = vpop.eup %253 }
  0xd0   :  { %v138_v55 = vmul.f32 %v254_v52, %v380_v0  ;;  %v139_v56 = vmul.f32 %v254_v52, %v382_v1  ;;  %v140_v57 = vmul.f32 %v254_v52, %v384_v2  ;;  %v141_v59 = vmul.f32 %v254_v52, %v386_v3 }
  0xd1   :  { %v256_v60 = vpop.eup %255  ;;  %v142_v61 = vmul.f32 %v254_v52, %v388_v4  ;;  %v143_v62 = vmul.f32 %v254_v52, %v404_v12 }
  0xd2   :  { %v194_v63 = vmul.f32 %v476_v47, %v138_v55  ;;  %v195_v5 = vmul.f32 %v478_v48, %v139_v56  ;;  %v196_v6 = vmul.f32 %v480_v49, %v140_v57  ;;  %v197_v7 = vmul.f32 %v482_v50, %v141_v59 }
  0xd3   :  { %v258_v0 = vpop.eup %257  ;;  %v198_v1 = vmul.f32 %v484_v53, %v142_v61  ;;  %v199_v2 = vmul.f32 %v486_v54, %v143_v62  ;;  %v126_v3 = vmul.f32 %v256_v60, %v398_v9  ;;  %v127_v8 = vmul.f32 %v256_v60, %v400_v10 }
  0xd4   :  { %218 = vst [vmem:[#allocation7 + $0x60] sm:$0xff] %v194_v63  ;;  %219 = vst [vmem:[#allocation7 + $0x68] sm:$0xff] %v195_v5  ;;  %v128_v4 = vmul.f32 %v256_v60, %v402_v11  ;;  %v129_v12 = vmul.f32 %v256_v60, %v406_v14  ;;  %v130_v13 = vmul.f32 %v256_v60, %v408_v15 }
  0xd5   :  { %220 = vst [vmem:[#allocation7 + $0x70] sm:$0xff] %v196_v6  ;;  %221 = vst [vmem:[#allocation7 + $0x78] sm:$0xff] %v197_v7  ;;  %v131_v16 = vmul.f32 %v256_v60, %v426_v25  ;;  %v182_v17 = vmul.f32 %v476_v47, %v126_v3  ;;  %v183_v9 = vmul.f32 %v478_v48, %v127_v8 }
  0xd6   :  { %222 = vst [vmem:[#allocation7 + $0x80] sm:$0xff] %v198_v1  ;;  %223 = vst [vmem:[#allocation7 + $0x88] sm:$0xff] %v199_v2  ;;  %v144_v10 = vmul.f32 %v258_v0, %v420_v21  ;;  %v145_v18 = vmul.f32 %v258_v0, %v422_v22  ;;  %v260_v19 = vpop.eup %259  ;;  %v184_v20 = vmul.f32 %v480_v49, %v128_v4 }
  0xd7   :  { %v185_v11 = vmul.f32 %v482_v50, %v129_v12  ;;  %v186_v14 = vmul.f32 %v484_v53, %v130_v13  ;;  %v187_v15 = vmul.f32 %v486_v54, %v131_v16  ;;  %206 = vst [vmem:[#allocation7] sm:$0xff] %v182_v17  ;;  %207 = vst [vmem:[#allocation7 + $0x8] sm:$0xff] %v183_v9 }
  0xd8   :  { %v146_v25 = vmul.f32 %v258_v0, %v424_v23  ;;  %v147_v24 = vmul.f32 %v258_v0, %v428_v27  ;;  %v148_v26 = vmul.f32 %v258_v0, %v430_v28  ;;  %v149_v21 = vmul.f32 %v258_v0, %v456_v44  ;;  %208 = vst [vmem:[#allocation7 + $0x10] sm:$0xff] %v184_v20 }
  0xd9   :  { %209 = vst [vmem:[#allocation7 + $0x18] sm:$0xff] %v185_v11  ;;  %210 = vst [vmem:[#allocation7 + $0x20] sm:$0xff] %v186_v14  ;;  %v200_v22 = vmul.f32 %v476_v47, %v144_v10  ;;  %v201_v29 = vmul.f32 %v478_v48, %v145_v18  ;;  %v132_v30 = vmul.f32 %v260_v19, %v444_v35 }
  0xda   :  { %211 = vst [vmem:[#allocation7 + $0x28] sm:$0xff] %v187_v15  ;;  %v133_v31 = vmul.f32 %v260_v19, %v446_v36  ;;  %v202_v23 = vmul.f32 %v480_v49, %v146_v25  ;;  %v203_v27 = vmul.f32 %v482_v50, %v147_v24  ;;  %v204_v28 = vmul.f32 %v484_v53, %v148_v26 }
  0xdb   :  { %v205_v44 = vmul.f32 %v486_v54, %v149_v21  ;;  %224 = vst [vmem:[#allocation7 + $0x90] sm:$0xff] %v200_v22  ;;  %225 = vst [vmem:[#allocation7 + $0x98] sm:$0xff] %v201_v29  ;;  %v134_v32 = vmul.f32 %v260_v19, %v448_v37  ;;  %v135_v33 = vmul.f32 %v260_v19, %v450_v41 }
  0xdc   :  { %v136_v35 = vmul.f32 %v260_v19, %v464_v51  ;;  %v137_v36 = vmul.f32 %v260_v19, %v470_v58  ;;  %226 = vst [vmem:[#allocation7 + $0xa0] sm:$0xff] %v202_v23  ;;  %227 = vst [vmem:[#allocation7 + $0xa8] sm:$0xff] %v203_v27  ;;  %v188_v34 = vmul.f32 %v476_v47, %v132_v30 }
  0xdd   :  { %228 = vst [vmem:[#allocation7 + $0xb0] sm:$0xff] %v204_v28  ;;  %229 = vst [vmem:[#allocation7 + $0xb8] sm:$0xff] %v205_v44  ;;  %v189_v38 = vmul.f32 %v478_v48, %v133_v31  ;;  %v190_v39 = vmul.f32 %v480_v49, %v134_v32  ;;  %v191_v40 = vmul.f32 %v482_v50, %v135_v33 }
  0xde   :  { %v192_v37 = vmul.f32 %v484_v53, %v136_v35  ;;  %v193_v41 = vmul.f32 %v486_v54, %v137_v36  ;;  %212 = vst [vmem:[#allocation7 + $0x30] sm:$0xff] %v188_v34 }
  0xdf   :  { %213 = vst [vmem:[#allocation7 + $0x38] sm:$0xff] %v189_v38  ;;  %214 = vst [vmem:[#allocation7 + $0x40] sm:$0xff] %v190_v39 }
  0xe0   :  { %215 = vst [vmem:[#allocation7 + $0x48] sm:$0xff] %v191_v40  ;;  %216 = vst [vmem:[#allocation7 + $0x50] sm:$0xff] %v192_v37 }
  0xe1   :  { %217 = vst [vmem:[#allocation7 + $0x58] sm:$0xff] %v193_v41 }
  0xe2   :  { %316 = shalt.err (!%p313_p6)
}
  0xe3   :  { %s317_s10 = scalar_lea.hbm %s553_s2, 3072 }
  0xe4   :  { %p318_p7 = scmp.ne.s32.totalorder %s553_s2, %s317_s10  ;;  %p321_p8 = scmp.lt.u32.totalorder %s317_s10, %s553_s2 }
  0xe6   :  { %p323_p9 = pnand %p321_p8, %p318_p7 }
  0xe8   :  { %326 = shalt.err (!%p323_p9)
}
  0xe9   :  { %241 = dma.vmem_to_hbm [thread:$0]  %s236_s6, 3072, %s553_s2, [#allocation4], %s334_s19, %s334_s19, %s335_s20  }
  0xea   :  { %331 = dma.done.wait [#allocation4], 3072  }
  0xeb   :  { %332 = vsyncadd [#allocation4], 4294964224 }
  0xec   :  { %245 = vsyncpa [#allocation3], 1 }
  0xed   :  { %246 = vsyncpa [#allocation6], 1 }
  0xee   :  { %247 = vsyncpa [#allocation4], 1 }

</bundles_post_ra>
